<compile_context>
chip_gen: v7x
topology: tpu7x:2x2x1
jax: 0.10.0
libtpu: 0.0.40
codegen_flags: <defaults>
</compile_context>

<pallas_src>
import jax
import jax.numpy as jnp
from jax.experimental import pallas as pl
from jax.experimental.pallas import tpu as pltpu


def _mha_kernel(x_ref, wq_ref, wk_ref, wv_ref, wo_ref, bo_ref, o_ref, acc_ref):
    """Grid = (batch_blocks, num_heads); one head of one batch block per step."""
    h = pl.program_id(1)
    bt, T, d_in = x_ref.shape
    dh = wq_ref.shape[-1]
    cdt = x_ref.dtype                      # MXU operand dtype (no f32 upcast)

    x2 = x_ref[...].reshape(bt * T, d_in)  # collapse (bt, T) -> rows

    # Per-head Q/K/V projections: native-dtype operands, f32 accumulation.
    # (softmax scale is already folded into W_q by the wrapper)
    q = jnp.dot(x2, wq_ref[0], preferred_element_type=jnp.float32)
    k = jnp.dot(x2, wk_ref[0], preferred_element_type=jnp.float32)
    v = jnp.dot(x2, wv_ref[0], preferred_element_type=jnp.float32)
    q3 = q.astype(cdt).reshape(bt, T, dh)
    k3 = k.astype(cdt).reshape(bt, T, dh)
    v3 = v.astype(cdt).reshape(bt, T, dh)

    # scores = q · kᵀ per batch row, without materializing a transpose.
    s = jnp.einsum("bqd,bkd->bqk", q3, k3, preferred_element_type=jnp.float32)

    # Causal mask: position i attends to j <= i.
    row = jax.lax.broadcasted_iota(jnp.int32, (T, T), 0)
    col = jax.lax.broadcasted_iota(jnp.int32, (T, T), 1)
    s = jnp.where((col > row)[None, :, :], -jnp.inf, s)

    # Numerically stable softmax stats in f32; normalization deferred.
    m = jnp.max(s, axis=-1, keepdims=True)
    e = jnp.exp(s - m)
    denom = jnp.sum(e, axis=-1, keepdims=True)           # (bt, T, 1)

    ctx = jnp.einsum("bqk,bkd->bqd", e.astype(cdt), v3,
                     preferred_element_type=jnp.float32)  # (bt, T, dh) f32
    ctx = ctx * pl.reciprocal(denom, approx=True)         # EUP, nearly free
    # TODO(synk): training-mode dropout on attention weights not implemented
    # (eval/inference semantics: dropout is identity).

    # Heads are a reduction axis of the output projection:
    #   concat(heads) @ W_o  ==  sum_h ctx_h @ W_o[h]
    @pl.when(h == 0)
    def _():
        acc_ref[...] = jnp.zeros_like(acc_ref)

    acc_ref[...] += jnp.dot(
        ctx.reshape(bt * T, dh).astype(cdt), wo_ref[0],
        preferred_element_type=jnp.float32).reshape(acc_ref.shape)

    @pl.when(h == pl.num_programs(1) - 1)
    def _():
        o_ref[...] = (acc_ref[...]
                      + bo_ref[...][None].astype(jnp.float32)).astype(o_ref.dtype)


def _pick_batch_block(B, max_block=8):
    """Largest divisor of B <= max_block, preferring >=2 batch grid steps
    (so both v7x TensorCores get parallel work)."""
    divs = [d for d in range(1, min(B, max_block) + 1) if B % d == 0]
    best = divs[-1]
    if B // best < 2:
        smaller = [d for d in divs if B // d >= 2]
        if smaller:
            best = smaller[-1]
    return best


def multi_head_attention(x, wq, wk, wv, wo, bo, *, num_heads,
                         batch_block=None, vmem_limit_bytes=None):
    """x: (B, T, d_in); wq/wk/wv: (d_in, d_out); wo: (d_out, d_out); bo: (1, d_out).

    Weights follow y = x @ W + b layout (i.e. PyTorch nn.Linear weights
    pre-transposed by the caller).
    """
    B, T, d_in = x.shape
    d_out = wq.shape[1]
    assert d_out % num_heads == 0, "d_out must be divisible by num_heads"
    head_dim = d_out // num_heads

    # One-time weight preprocessing (host/XLA side, done once per call here,
    # once at load time in a real model):
    #   * fold the 1/sqrt(head_dim) softmax scale into W_q,
    #   * split the head axis out as a leading dim so each grid step DMAs only
    #     its own head's weight slice (and blocks satisfy the tiling rule).
    scale = 1.0 / (head_dim ** 0.5)
    wq3 = jnp.transpose((wq * scale).astype(wq.dtype).reshape(d_in, num_heads, head_dim),
                        (1, 0, 2))                       # (H, d_in, Dh)
    wk3 = jnp.transpose(wk.reshape(d_in, num_heads, head_dim), (1, 0, 2))
    wv3 = jnp.transpose(wv.reshape(d_in, num_heads, head_dim), (1, 0, 2))
    wo3 = wo.reshape(num_heads, head_dim, d_out)         # (H, Dh, d_out)

    bt = batch_block if batch_block is not None else _pick_batch_block(B)
    assert B % bt == 0, "batch_block must divide B"
    grid = (B // bt, num_heads)

    cp_kwargs = dict(dimension_semantics=("parallel", "arbitrary"))
    if vmem_limit_bytes is not None:
        cp_kwargs["vmem_limit_bytes"] = vmem_limit_bytes

    return pl.pallas_call(
        _mha_kernel,
        out_shape=jax.ShapeDtypeStruct((B, T, d_out), x.dtype),
        grid_spec=pltpu.PrefetchScalarGridSpec(
            num_scalar_prefetch=0,
            grid=grid,
            in_specs=[
                # x block is re-used across the inner head axis (same index ->
                # not re-fetched); weights are per-head slices.
                pl.BlockSpec((bt, T, d_in), lambda b, h: (b, 0, 0)),
                pl.BlockSpec((1, d_in, head_dim), lambda b, h: (h, 0, 0)),
                pl.BlockSpec((1, d_in, head_dim), lambda b, h: (h, 0, 0)),
                pl.BlockSpec((1, d_in, head_dim), lambda b, h: (h, 0, 0)),
                pl.BlockSpec((1, head_dim, d_out), lambda b, h: (h, 0, 0)),
                # bias is constant; could be single-buffered via
                # pipeline_mode=pl.Buffered(1), left at default for portability.
                pl.BlockSpec((1, d_out), lambda b, h: (0, 0)),
            ],
            out_specs=pl.BlockSpec((bt, T, d_out), lambda b, h: (b, 0, 0)),
            scratch_shapes=[pltpu.VMEM((bt, T, d_out), jnp.float32)],
        ),
        compiler_params=pltpu.CompilerParams(**cp_kwargs),
    )(x, wq3, wk3, wv3, wo3, bo)


def _reference(x, wq, wk, wv, wo, bo, num_heads):
    """Pure-JAX reference mirroring the PyTorch forward (eval mode), f32."""
    B, T, d_in = x.shape
    d_out = wq.shape[1]
    head_dim = d_out // num_heads
    q = (x @ wq).reshape(B, T, num_heads, head_dim).transpose(0, 2, 1, 3)
    k = (x @ wk).reshape(B, T, num_heads, head_dim).transpose(0, 2, 1, 3)
    v = (x @ wv).reshape(B, T, num_heads, head_dim).transpose(0, 2, 1, 3)
    scores = jnp.einsum("bhqd,bhkd->bhqk", q, k)
    mask = jnp.triu(jnp.ones((T, T), dtype=bool), k=1)
    scores = jnp.where(mask, -jnp.inf, scores)
    attn = jax.nn.softmax(scores / head_dim ** 0.5, axis=-1)
    ctx = jnp.einsum("bhqk,bhkd->bhqd", attn, v).transpose(0, 2, 1, 3).reshape(B, T, d_out)
    return ctx @ wo + bo


if __name__ == "__main__":
    # Module config: d_in=32, d_out=32, context_length=8, dropout=0.0, num_heads=4
    B, T, d_in, d_out, num_heads = 2, 8, 32, 32, 4

    key = jax.random.PRNGKey(0)
    kx, kq, kk, kv, ko, kb = jax.random.split(key, 6)

    x = jax.random.normal(kx, (B, T, d_in), dtype=jnp.float32)
    s = 1.0 / (d_in ** 0.5)
    wq = jax.random.uniform(kq, (d_in, d_out), jnp.float32, -s, s)
    wk = jax.random.uniform(kk, (d_in, d_out), jnp.float32, -s, s)
    wv = jax.random.uniform(kv, (d_in, d_out), jnp.float32, -s, s)
    so = 1.0 / (d_out ** 0.5)
    wo = jax.random.uniform(ko, (d_out, d_out), jnp.float32, -so, so)
    bo = jax.random.uniform(kb, (1, d_out), jnp.float32, -so, so)

    ref = _reference(x, wq, wk, wv, wo, bo, num_heads)

    # f32 run (only deviation from the reference is the approx EUP reciprocal).
    out = multi_head_attention(x, wq, wk, wv, wo, bo, num_heads=num_heads)
    out = jax.block_until_ready(out)
    assert out.shape == (B, T, d_out)
    assert jnp.allclose(out, ref, atol=5e-3, rtol=5e-3)

    # bf16 run: MXU operands in bf16, f32 accumulation + f32 softmax stats.
    to_bf16 = lambda a: a.astype(jnp.bfloat16)
    out_bf16 = multi_head_attention(to_bf16(x), to_bf16(wq), to_bf16(wk),
                                    to_bf16(wv), to_bf16(wo), to_bf16(bo),
                                    num_heads=num_heads)
    out_bf16 = jax.block_until_ready(out_bf16)
    assert out_bf16.shape == (B, T, d_out)
    assert jnp.allclose(out_bf16.astype(jnp.float32), ref, atol=5e-2, rtol=5e-2)

    print("KERNEL_OK")
</pallas_src>

<mosaic_0001>
module attributes {stable_mosaic.version = 11 : i64} {
  func.func @_mha_kernel(%arg0: i32, %arg1: i32, %arg2: memref<1x8x32xf32, #tpu.memory_space<vmem>>, %arg3: memref<1x32x8xf32, #tpu.memory_space<vmem>>, %arg4: memref<1x32x8xf32, #tpu.memory_space<vmem>>, %arg5: memref<1x32x8xf32, #tpu.memory_space<vmem>>, %arg6: memref<1x8x32xf32, #tpu.memory_space<vmem>>, %arg7: memref<1x32xf32, #tpu.memory_space<vmem>>, %arg8: memref<1x8x32xf32, #tpu.memory_space<vmem>>, %arg9: memref<1x8x32xf32, #tpu.memory_space<vmem>>) attributes {dimension_semantics = [#tpu.dimension_semantics<parallel>, #tpu.dimension_semantics<arbitrary>], iteration_bounds = array<i64: 2, 4>, scalar_prefetch = 0 : i64, scratch_operands = 1 : i64, tpu.core_type = #tpu.core_type<tc>, window_params = [{transform_indices = @transform_0, window_bounds = array<i64: 1, 8, 32>}, {transform_indices = @transform_1, window_bounds = array<i64: 1, 32, 8>}, {transform_indices = @transform_2, window_bounds = array<i64: 1, 32, 8>}, {transform_indices = @transform_3, window_bounds = array<i64: 1, 32, 8>}, {transform_indices = @transform_4, window_bounds = array<i64: 1, 8, 32>}, {pipeline_mode = #tpu.pipeline_mode<synchronous>, transform_indices = @transform_5, window_bounds = array<i64: 1, 32>}, {transform_indices = @transform_6, window_bounds = array<i64: 1, 8, 32>}]} {
    %c0 = arith.constant 0 : index
    %c0_0 = arith.constant 0 : index
    %c0_1 = arith.constant 0 : index
    %0 = vector.load %arg2[%c0, %c0_0, %c0_1] : memref<1x8x32xf32, #tpu.memory_space<vmem>>, vector<1x8x32xf32>
    %1 = vector.shape_cast %0 : vector<1x8x32xf32> to vector<8x32xf32>
    %c0_2 = arith.constant 0 : index
    %c0_3 = arith.constant 0 : index
    %c0_4 = arith.constant 0 : index
    %2 = vector.load %arg3[%c0_2, %c0_3, %c0_4] : memref<1x32x8xf32, #tpu.memory_space<vmem>>, vector<1x32x8xf32>
    %3 = vector.shape_cast %2 : vector<1x32x8xf32> to vector<32x8xf32>
    %cst = arith.constant dense<0.000000e+00> : vector<8x8xf32>
    %4 = tpu.matmul %1, %3, %cst {dimension_numbers = #tpu.dot_dimension_numbers<[1], [0], [0], [1], [0, 0, 1, 1], [], []>} : vector<8x32xf32>, vector<32x8xf32>, vector<8x8xf32> -> vector<8x8xf32>
    %c0_5 = arith.constant 0 : index
    %c0_6 = arith.constant 0 : index
    %c0_7 = arith.constant 0 : index
    %5 = vector.load %arg4[%c0_5, %c0_6, %c0_7] : memref<1x32x8xf32, #tpu.memory_space<vmem>>, vector<1x32x8xf32>
    %6 = vector.shape_cast %5 : vector<1x32x8xf32> to vector<32x8xf32>
    %cst_8 = arith.constant dense<0.000000e+00> : vector<8x8xf32>
    %7 = tpu.matmul %1, %6, %cst_8 {dimension_numbers = #tpu.dot_dimension_numbers<[1], [0], [0], [1], [0, 0, 1, 1], [], []>} : vector<8x32xf32>, vector<32x8xf32>, vector<8x8xf32> -> vector<8x8xf32>
    %c0_9 = arith.constant 0 : index
    %c0_10 = arith.constant 0 : index
    %c0_11 = arith.constant 0 : index
    %8 = vector.load %arg5[%c0_9, %c0_10, %c0_11] : memref<1x32x8xf32, #tpu.memory_space<vmem>>, vector<1x32x8xf32>
    %9 = vector.shape_cast %8 : vector<1x32x8xf32> to vector<32x8xf32>
    %cst_12 = arith.constant dense<0.000000e+00> : vector<8x8xf32>
    %10 = tpu.matmul %1, %9, %cst_12 {dimension_numbers = #tpu.dot_dimension_numbers<[1], [0], [0], [1], [0, 0, 1, 1], [], []>} : vector<8x32xf32>, vector<32x8xf32>, vector<8x8xf32> -> vector<8x8xf32>
    %11 = vector.shape_cast %4 : vector<8x8xf32> to vector<1x8x8xf32>
    %12 = vector.shape_cast %7 : vector<8x8xf32> to vector<1x8x8xf32>
    %13 = vector.shape_cast %10 : vector<8x8xf32> to vector<1x8x8xf32>
    "tpu.trace_start"() <{level = 10 : i32, message = "bqd,bkd->bqk"}> : () -> ()
    %cst_13 = arith.constant dense<0.000000e+00> : vector<1x8x8xf32>
    %14 = tpu.matmul %11, %12, %cst_13 {dimension_numbers = #tpu.dot_dimension_numbers<[2], [2], [1], [1], [0, 0, 0, 1, 1, 1], [0], [0]>} : vector<1x8x8xf32>, vector<1x8x8xf32>, vector<1x8x8xf32> -> vector<1x8x8xf32>
    "tpu.trace_stop"() : () -> ()
    %15 = tpu.iota {dimensions = array<i32: 0>} : vector<8x8xi32>
    %16 = tpu.iota {dimensions = array<i32: 1>} : vector<8x8xi32>
    %17 = arith.cmpi sgt, %16, %15 : vector<8x8xi32>
    %18 = vector.shape_cast %17 : vector<8x8xi1> to vector<1x8x8xi1>
    %cst_14 = arith.constant 0xFF800000 : f32
    %19 = vector.broadcast %cst_14 : f32 to vector<1x8x8xf32>
    %20 = arith.select %18, %19, %14 : vector<1x8x8xi1>, vector<1x8x8xf32>
    %cst_15 = arith.constant dense<0xFF800000> : vector<1x8xf32>
    %21 = vector.multi_reduction <maximumf>, %20, %cst_15 [2] : vector<1x8x8xf32> to vector<1x8xf32>
    %22 = vector.shape_cast %21 : vector<1x8xf32> to vector<1x8x1xf32>
    %23 = vector.broadcast %22 : vector<1x8x1xf32> to vector<1x8x8xf32>
    %24 = arith.subf %20, %23 : vector<1x8x8xf32>
    %25 = math.exp %24 : vector<1x8x8xf32>
    %cst_16 = arith.constant dense<0.000000e+00> : vector<1x8xf32>
    %26 = vector.multi_reduction <add>, %25, %cst_16 [2] : vector<1x8x8xf32> to vector<1x8xf32>
    %27 = vector.shape_cast %26 : vector<1x8xf32> to vector<1x8x1xf32>
    "tpu.trace_start"() <{level = 10 : i32, message = "bqk,bkd->bqd"}> : () -> ()
    %cst_17 = arith.constant dense<0.000000e+00> : vector<1x8x8xf32>
    %28 = tpu.matmul %25, %13, %cst_17 {dimension_numbers = #tpu.dot_dimension_numbers<[2], [1], [1], [2], [0, 0, 0, 1, 1, 2], [0], [0]>} : vector<1x8x8xf32>, vector<1x8x8xf32>, vector<1x8x8xf32> -> vector<1x8x8xf32>
    "tpu.trace_stop"() : () -> ()
    %29 = tpu.reciprocal %27 {approx = true} : vector<1x8x1xf32> -> vector<1x8x1xf32>
    %30 = vector.broadcast %29 : vector<1x8x1xf32> to vector<1x8x8xf32>
    %31 = arith.mulf %28, %30 : vector<1x8x8xf32>
    %c0_i32 = arith.constant 0 : i32
    %32 = arith.cmpi eq, %arg1, %c0_i32 : i32
    %33 = arith.extui %32 : i1 to i32
    %c0_i32_18 = arith.constant 0 : i32
    %34 = arith.cmpi ne, %33, %c0_i32_18 : i32
    scf.if %34 {
      %cst_30 = arith.constant 0.000000e+00 : f32
      %46 = vector.broadcast %cst_30 : f32 to vector<1x8x32xf32>
      %c0_31 = arith.constant 0 : index
      %c0_32 = arith.constant 0 : index
      %c0_33 = arith.constant 0 : index
      %47 = vector.load %arg9[%c0_31, %c0_32, %c0_33] : memref<1x8x32xf32, #tpu.memory_space<vmem>>, vector<1x8x32xf32>
      tpu.vector_store %arg9[%c0_31, %c0_32, %c0_33], %46 {strides = array<i32>} : memref<1x8x32xf32, #tpu.memory_space<vmem>>, vector<1x8x32xf32>,
    } else {
    }
    %c0_19 = arith.constant 0 : index
    %c0_20 = arith.constant 0 : index
    %c0_21 = arith.constant 0 : index
    %35 = vector.load %arg9[%c0_19, %c0_20, %c0_21] : memref<1x8x32xf32, #tpu.memory_space<vmem>>, vector<1x8x32xf32>
    %36 = vector.shape_cast %31 : vector<1x8x8xf32> to vector<8x8xf32>
    %c0_22 = arith.constant 0 : index
    %c0_23 = arith.constant 0 : index
    %c0_24 = arith.constant 0 : index
    %37 = vector.load %arg6[%c0_22, %c0_23, %c0_24] : memref<1x8x32xf32, #tpu.memory_space<vmem>>, vector<1x8x32xf32>
    %38 = vector.shape_cast %37 : vector<1x8x32xf32> to vector<8x32xf32>
    %cst_25 = arith.constant dense<0.000000e+00> : vector<8x32xf32>
    %39 = tpu.matmul %36, %38, %cst_25 {dimension_numbers = #tpu.dot_dimension_numbers<[1], [0], [0], [1], [0, 0, 1, 1], [], []>} : vector<8x8xf32>, vector<8x32xf32>, vector<8x32xf32> -> vector<8x32xf32>
    %40 = vector.shape_cast %39 : vector<8x32xf32> to vector<1x8x32xf32>
    %41 = arith.addf %35, %40 : vector<1x8x32xf32>
    %c0_26 = arith.constant 0 : index
    %c0_27 = arith.constant 0 : index
    %c0_28 = arith.constant 0 : index
    %42 = vector.load %arg9[%c0_26, %c0_27, %c0_28] : memref<1x8x32xf32, #tpu.memory_space<vmem>>, vector<1x8x32xf32>
    tpu.vector_store %arg9[%c0_26, %c0_27, %c0_28], %41 {strides = array<i32>} : memref<1x8x32xf32, #tpu.memory_space<vmem>>, vector<1x8x32xf32>,
    %c3_i32 = arith.constant 3 : i32
    %43 = arith.cmpi eq, %arg1, %c3_i32 : i32
    %44 = arith.extui %43 : i1 to i32
    %c0_i32_29 = arith.constant 0 : i32
    %45 = arith.cmpi ne, %44, %c0_i32_29 : i32
    scf.if %45 {
      %c0_30 = arith.constant 0 : index
      %c0_31 = arith.constant 0 : index
      %c0_32 = arith.constant 0 : index
      %46 = vector.load %arg9[%c0_30, %c0_31, %c0_32] : memref<1x8x32xf32, #tpu.memory_space<vmem>>, vector<1x8x32xf32>
      %c0_33 = arith.constant 0 : index
      %c0_34 = arith.constant 0 : index
      %47 = vector.load %arg7[%c0_33, %c0_34] : memref<1x32xf32, #tpu.memory_space<vmem>>, vector<1x32xf32>
      %48 = vector.shape_cast %47 : vector<1x32xf32> to vector<1x1x32xf32>
      %49 = vector.broadcast %48 : vector<1x1x32xf32> to vector<1x8x32xf32>
      %50 = arith.addf %46, %49 : vector<1x8x32xf32>
      %c0_35 = arith.constant 0 : index
      %c0_36 = arith.constant 0 : index
      %c0_37 = arith.constant 0 : index
      %51 = vector.load %arg8[%c0_35, %c0_36, %c0_37] : memref<1x8x32xf32, #tpu.memory_space<vmem>>, vector<1x8x32xf32>
      tpu.vector_store %arg8[%c0_35, %c0_36, %c0_37], %50 {strides = array<i32>} : memref<1x8x32xf32, #tpu.memory_space<vmem>>, vector<1x8x32xf32>,
    } else {
    }
    return
  }
  func.func @transform_0(%arg0: i32, %arg1: i32) -> (i32, i32, i32) {
    %c0_i32 = arith.constant 0 : i32
    %c0_i32_0 = arith.constant 0 : i32
    %c0_i32_1 = arith.constant 0 : i32
    return %arg0, %c0_i32, %c0_i32_0 : i32, i32, i32
  }
  func.func @transform_1(%arg0: i32, %arg1: i32) -> (i32, i32, i32) {
    %c0_i32 = arith.constant 0 : i32
    %c0_i32_0 = arith.constant 0 : i32
    %c0_i32_1 = arith.constant 0 : i32
    return %arg1, %c0_i32, %c0_i32_0 : i32, i32, i32
  }
  func.func @transform_2(%arg0: i32, %arg1: i32) -> (i32, i32, i32) {
    %c0_i32 = arith.constant 0 : i32
    %c0_i32_0 = arith.constant 0 : i32
    %c0_i32_1 = arith.constant 0 : i32
    return %arg1, %c0_i32, %c0_i32_0 : i32, i32, i32
  }
  func.func @transform_3(%arg0: i32, %arg1: i32) -> (i32, i32, i32) {
    %c0_i32 = arith.constant 0 : i32
    %c0_i32_0 = arith.constant 0 : i32
    %c0_i32_1 = arith.constant 0 : i32
    return %arg1, %c0_i32, %c0_i32_0 : i32, i32, i32
  }
  func.func @transform_4(%arg0: i32, %arg1: i32) -> (i32, i32, i32) {
    %c0_i32 = arith.constant 0 : i32
    %c0_i32_0 = arith.constant 0 : i32
    %c0_i32_1 = arith.constant 0 : i32
    return %arg1, %c0_i32, %c0_i32_0 : i32, i32, i32
  }
  func.func @transform_5(%arg0: i32, %arg1: i32) -> (i32, i32) {
    %c0_i32 = arith.constant 0 : i32
    %c0_i32_0 = arith.constant 0 : i32
    %c0_i32_1 = arith.constant 0 : i32
    return %c0_i32, %c0_i32_0 : i32, i32
  }
  func.func @transform_6(%arg0: i32, %arg1: i32) -> (i32, i32, i32) {
    %c0_i32 = arith.constant 0 : i32
    %c0_i32_0 = arith.constant 0 : i32
    %c0_i32_1 = arith.constant 0 : i32
    return %arg0, %c0_i32, %c0_i32_0 : i32, i32, i32
  }
}

</mosaic_0001>

<bundles_post_ra>
// kernel: tpu_custom_call.1
= control target key start
LH: loop header
LB: loop body
LE: loop exit
PB: predicated region body
PF: predicated region fallthrough
CT: control target
= control target key end

     0   :  { %11 = vsyncpa [#allocation4], 0  ;;  %s1478_s0 = inlined_call_operand.vmem [shape: f32[2,8,32], index: 0, kind: input, shape index: {}]   ;;  %s1479_s1 = inlined_call_operand.vmem [shape: f32[4,32,8], index: 1, kind: input, shape index: {}]   ;;  %s1480_s2 = inlined_call_operand.vmem [shape: f32[4,32,8], index: 2, kind: input, shape index: {}]   ;;  %s1481_s3 = inlined_call_operand.vmem [shape: f32[4,32,8], index: 3, kind: input, shape index: {}]   ;;  %s1482_s4 = inlined_call_operand.vmem [shape: f32[4,8,32], index: 4, kind: input, shape index: {}]   ;;  %s1483_s5 = inlined_call_operand.vmem [shape: f32[1,32], index: 5, kind: input, shape index: {}]   ;;  %s1484_s6 = inlined_call_operand.hbm [shape: f32[2,8,32], index: 6, kind: output, shape index: {}]  }
   0x1   :  { %13 = vsyncpa [#allocation4 + $0x1], 0  ;;  %s1291_s21 = smov 0   ;;  %s1293_s22 = smov 0  }
   0x2   :  { %s1295_s23 = smov 0   ;;  %s1297_s24 = smov 0  }
   0x3   :  { %s1299_s25 = smov 0   ;;  %s1301_s26 = smov 0  }
   0x4   :  { %s1303_s27 = smov 0   ;;  %s1305_s28 = smov 0  }
   0x5 LB: > { %s958_s29 = sadd.s32 4294967295, %s1249_s28   ;;  %s959_s30 = sadd.s32 4294967294, %s1249_s28   ;;  %s1249_s28 = sphi %s1305_s28, %s19_s28   ;;  %s1245_s27 = sphi %s1303_s27, %s1500_s27   ;;  %s1241_s26 = sphi %s1301_s26, %s1499_s26   ;;  %s1237_s25 = sphi %s1299_s25, %s1498_s25   ;;  %s1233_s24 = sphi %s1297_s24, %s1497_s24   ;;  %s1229_s23 = sphi %s1295_s23, %s1496_s23   ;;  %s1225_s22 = sphi %s1293_s22, %s1495_s22   ;;  %s1221_s21 = sphi %s1291_s21, %s1494_s21  }
   0x6   : > { %s28_s7 = sadd.s32 1, %s1241_s26  ;;  %s31_s8 = sadd.s32 1, %s1245_s27 }
   0x7   : > { %p29_p0 = scmp.ge.s32.totalorder %s28_s7, 4  ;;  %p199_p1 = scmp.ne.s32.totalorder %s1229_s23, %s1225_s22 }
   0x8   : > { %p200_p2 = scmp.eq.s32.totalorder %s958_s29, 7  ;;  %p205_p4 = scmp.ne.s32.totalorder %s1225_s22, %s1221_s21 }
   0x9   : > { %s1502_s7 = smov (%p29_p0, %s28_s7), 0  ;;  %s1504_s8 = smov (!%p29_p0, %s31_s8), %s1245_s27 }
   0xa   : > { %1487 = sst [smem:[#allocation6_spill]] %s1502_s7  ;;  %p1340_p3 = por %p200_p2, %p199_p1 }
   0xb   : > { %p33_p5 = scmp.ge.s32.totalorder %s1504_s8, 2  ;;  %p206_p6 = scmp.eq.s32.totalorder %s959_s30, 7 }
   0xc   : > { %p962_p7 = scmp.ge.s32.totalorder %s1249_s28, 1  ;;  %p265_p8 = scmp.lt.s32.totalorder %s1249_s28, 9 }
   0xd   : > { %s1506_s8 = smov (%p33_p5, %s1504_s8), 0  ;;  %p1350_p9 = por %p206_p6, %p205_p4 }
   0xe   : > { %1489 = sst [smem:[#allocation7_spill]] %s1506_s8  ;;  %p266_p10 = pnand %p962_p7, %p265_p8 }
   0xf   : > { %s186_s11 = ssub.s32 %s1245_s27, %s1506_s8  ;;  %s189_s12 = sadd.s32 1, %s1229_s23  ;;  %v1251_v0 = vmov (!%p266_p10), 0.0|0.0   ;;  %vm1252_vm0 = vmmov (!%p266_p10), 0   ;;  %v1253_v1 = vmov (!%p266_p10), 0.0   ;;  %vm341_vm1 = vcmask (!%p266_p10), 261120  }
  0x10   : > { %p187_p11 = scmp.eq.s32.totalorder %s186_s11, 0  ;;  %269 = sbr.rel (%p266_p10) target bundleno = 1088 (0x440), region = 44  ;;  %1064 = vmatprep.subr.bf16.mxu1 (!%p266_p10), %v1251_v0  ;;  %1058 = vmatprep.subr.bf16.mxu0 (!%p266_p10), %v1251_v0  ;;  %vm563_vm2 = vcmask (!%p266_p10), 64512   ;;  %v640_v25 = vlaneseq (!%p266_p10) }
  0x11   : > { %p317_p12 = scmp.lt.s32.totalorder (!%p266_p10), %s1233_s24, 3  ;;  %s1485_s14 = sand.u32 (!%p266_p10), 1, %s1225_s22   ;;  %1029 = vmatprep.mubr.msk.f32.mxu1 (!%p266_p10), %vm1252_vm0, %v1253_v1  ;;  %1018 = vmatprep.mubr.msk.f32.mxu0 (!%p266_p10), %vm1252_vm0, %v1253_v1 }
  0x12   : > { %s1358_s13 = scalar_select %p187_p11, %s1229_s23, %s189_s12  }
  0x13   : > { %s1364_s15 = sshll.u32 (!%p266_p10), %s1485_s14, 3  ;;  %p313_p13 = scmp.lt.s32.totalorder (!%p266_p10), %s1237_s25, 1  ;;  %v641_v26 = vshrl.u32 (!%p266_p10), %v640_v25, 7  ;;  %v643_v27 = vand.u32 (!%p266_p10), 127, %v640_v25 }
  0x14   : > { %p978_p0 = scmp.ne.s32.totalorder (!%p266_p10), %s1233_s24, 0 }
  0x15   : > { %vm644_vm3 = vcmp.gt.s32.totalorder (!%p266_p10), %v643_v27, %v641_v26 }
  0x17   : > { %s318_s16 = scalar_select %p317_p12, %s1233_s24, 3 }
  0x18   : > { %v1254_v44 = vmov (!%p978_p0), 0.0  }
  0x19   : > { %s1372_s17 = sshll.u32 %s318_s16, 5  ;;  %s971_s18 = sshll.u32 %s318_s16, 3  ;;  %734 = vst.msk [vmem:[#allocation2] sm:$0xff] (!%p978_p0), %vm341_vm1, %v1254_v44 }
  0x1a   : > { %s326_s29 = scalar_lea.vmem %s1480_s2, %s1372_s17  ;;  %s1381_s12 = scalar_lea.vmem %s1482_s4, %s971_s18 }
  0x1b   : > { %v415_v2 = vld [vmem:[%s326_s29] sm:$0xff]  ;;  %v416_v3 = vld [vmem:[%s326_s29 + $0x8] sm:$0xff]  ;;  %s321_s7 = scalar_lea.vmem %s1479_s1, %s1372_s17  ;;  %v417_v4 = vld [vmem:[%s326_s29 + $0x10] sm:$0xff] }
  0x1c   : > { %v1065_v5 = vpack.c.bf16 %v416_v3, %v415_v2  ;;  %v337_v6 = vld [vmem:[%s321_s7] sm:$0xff]  ;;  %v338_v7 = vld [vmem:[%s321_s7 + $0x8] sm:$0xff]  ;;  %v418_v8 = vld [vmem:[%s326_s29 + $0x18] sm:$0xff]  ;;  %s314_s16 = scalar_select %p313_p13, %s1237_s25, 1 }
  0x1d   : > { %v1059_v9 = vpack.c.bf16 %v338_v7, %v337_v6  ;;  %v339_v10 = vld [vmem:[%s321_s7 + $0x10] sm:$0xff]  ;;  %v340_v11 = vld [vmem:[%s321_s7 + $0x18] sm:$0xff]  ;;  %v1068_v12 = vpack.c.bf16 %v418_v8, %v417_v4  ;;  %s331_s29 = scalar_lea.vmem %s1481_s3, %s1372_s17  ;;  %s312_s17 = scalar_lea.vmem [#allocation3], %s1364_s15 }
  0x1e   : > { %1066 = vmatpush3.bf16.msra.mxu1 %v1065_v5  ;;  %s964_s19 = sshll.u32 %s314_s16, 3  ;;  %v1062_v13 = vpack.c.bf16 %v340_v11, %v339_v10  ;;  %v489_v15 = vld [vmem:[%s331_s29] sm:$0xff]  ;;  %v490_v16 = vld [vmem:[%s331_s29 + $0x8] sm:$0xff]  ;;  %v491_v17 = vld [vmem:[%s331_s29 + $0x10] sm:$0xff] }
  0x1f   : > { %1060 = vmatpush3.bf16.msra.mxu0 %v1059_v9  ;;  %1067 = vmatprep.subr.bf16.mxu1 %v1251_v0  ;;  %s316_s8 = scalar_lea.vmem %s1478_s0, %s964_s19  ;;  %v1071_v18 = vpack.c.bf16 %v490_v16, %v489_v15  ;;  %v492_v19 = vld [vmem:[%s331_s29 + $0x18] sm:$0xff] }
  0x20   : > { %1061 = vmatprep.subr.bf16.mxu0 %v1251_v0  ;;  %v336_v14 = vld [vmem:[%s316_s8] sm:$0xff]  ;;  %v1074_v20 = vpack.c.bf16 %v492_v19, %v491_v17 }
  0x22   : > { %1069 = vmatpush3.bf16.msra.mxu1 %v1068_v12 }
  0x23   : > { %1063 = vmatpush3.bf16.msra.mxu0 %v1062_v13  ;;  %1043 = vmatprep.subr.mxu1 %v1253_v1 }
  0x24   : > { %1070 = vmatprep.subr.bf16.mxu0 %v1251_v0 }
  0x25   : > { %1030 = vmatmul.mubr.msk.f32.vlgmr.msra.gmra.mrb[0].mxu1 %vm341_vm1, %v336_v14 }
  0x26   : > { %1019 = vmatmul.mubr.msk.f32.vlgmr.msra.gmra.mrb[0].mxu0 %vm341_vm1, %v336_v14  ;;  %1045 = vmatprep.mubr.msk.f32.mxu1 %vm1252_vm0, %v1253_v1 }
  0x27   : > { %1040 = vmatprep.mubr.msk.f32.mxu0 %vm1252_vm0, %v1253_v1  ;;  %1072 = vmatpush3.bf16.msra.mxu0 %v1071_v18 }
  0x28   : > { %1073 = vmatprep.subr.bf16.mxu0 %v1251_v0 }
  0x2b   : > { %1075 = vmatpush3.bf16.msra.mxu0 %v1074_v20 }
  0x2e   : > { %1041 = vmatmul.mubr.msk.f32.vlgmr.msra.gmra.mrb[2].mxu0 %vm341_vm1, %v336_v14 }
  0xf8   : > { %v485_v21 = vpop.f32.mrb[0].mxu1 }
  0xf9   : > { %v1031_v22 = vpop.f32.mrb[1].mxu1  ;;  %1044 = vmatpush3.xpose.msk.msra.mxu1 %vm563_vm2, %v485_v21  ;;  %v411_v23 = vpop.f32.mrb[0].mxu0 }
  0xfa   : > { %v1020_v24 = vpop.f32.mrb[1].mxu0  ;;  %1048 = vmatprep.subr.mxu1 %v1253_v1 }
  0xfc   : > { %1046 = vmatmul.mubr.msk.f32.vlgmr.msra.gmra.mrb[2].mxu1 %vm563_vm2, %v411_v23 }
  0xfd   : > { %1050 = vmatprep.mubr.msk.f32.mxu1 %vm1252_vm0, %v1253_v1 }
 0x101   : > { %v559_v32 = vpop.f32.mrb[2].mxu0 }
 0x102   : > { %v1042_v33 = vpop.f32.mrb[3].mxu0  ;;  %1049 = vmatpush3.msra.mxu1 %v559_v32 }
 0x1cf   : > { %v636_v28 = vpop.f32.mrb[2].mxu1 }
 0x1d0   : > { %v645_v29 = vsel %vm644_vm3, -inf, %v636_v28  ;;  %v1047_v30 = vpop.f32.mrb[3].mxu1 }
 0x1d1   : > { %v646_v31 = vsel %vm563_vm2, %v645_v29, -inf }
 0x1d2   : > { %647 = vmax.xlane.f32.xlu0 %v646_v31 }
 0x25f   : > { %v648_v34 = vpop.xlane.xlu0 %647 }
 0x260   : > { %v649_v35 = vsub.f32 %v645_v29, %v648_v34 }
 0x262   : > { %v650_v36 = vmul.f32 1.442695, %v649_v35 }
 0x264   : > { %1151 = vpow2.f32 %v650_v36 }
 0x26e   : > { %v1152_v37 = vpop.eup %1151 }
 0x26f   : > { %1051 = vmatmul.mubr.msk.f32.vlgmr.msra.gmra.mrb[4].mxu1 %vm563_vm2, %v1152_v37  ;;  %v652_v38 = vsel %vm563_vm2, %v1152_v37, 0.0 }
 0x270   : > { %653 = vadd.xlane.f32.xlu0 %v652_v38 }
 0x2fd   : > { %v654_v39 = vpop.xlane.xlu0 %653 }
 0x2fe   : > { %1153 = vrcp.f32 %v654_v39 }
 0x308   : > { %v1154_v40 = vpop.eup %1153 }
 0x33d   : > { %733 = sbr.rel (%p978_p0) target bundleno = 836 (0x344), region = 48 }
 0x342   : > { %v724_v41 = vpop.f32.mrb[4].mxu1 }
 0x343   : > { %v729_v42 = vmul.f32 %v1154_v40, %v724_v41  ;;  %v1052_v43 = vpop.f32.mrb[5].mxu1 }
 0x344 PF: > { %1053 = vmatprep.subr.mxu0 %v1253_v1  ;;  %v736_v45 = vld [vmem:[%s1381_s12] sm:$0xff]  ;;  %1055 = vmatprep.mubr.msk.f32.mxu0 %vm1252_vm0, %v1253_v1  ;;  %p980_p1 = scmp.ne.s32.totalorder %s1233_s24, 3 }
 0x345   : > { %1054 = vmatpush3.msra.mxu0 %v736_v45  ;;  %v735_v46 = vld [vmem:[#allocation2] sm:$0xff] }
 0x346   : > { %1056 = vmatmul.mubr.msk.f32.vlgmr.msra.gmra.mrb[4].mxu0 %vm563_vm2, %v729_v42  ;;  %v981_v51 = vld [vmem:[%s1483_s5] ss:$0 sm:$0xff] (!%p980_p1) }
 0x416   : > { %815 = sbr.rel (%p980_p1) target bundleno = 1063 (0x427), region = 52 }
 0x419   : > { %v806_v47 = vpop.f32.mrb[4].mxu0 }
 0x41a   : > { %v810_v48 = vadd.f32 %v806_v47, %v735_v46  ;;  %v1057_v49 = vpop.f32.mrb[5].mxu0 }
 0x41c   : > { %811 = vst.msk [vmem:[#allocation2] sm:$0xff] %vm341_vm1, %v810_v48 }
 0x423   : > { %v816_v50 = vld [vmem:[#allocation2] sm:$0xff] }
 0x424   : > { %v824_v52 = vadd.f32 %v981_v51, %v816_v50 }
 0x426   : > { %825 = vst.msk [vmem:[%s312_s17] sm:$0xff] %vm341_vm1, %v824_v52 }
 0x427 PF: > { %s983_s11 = sshll.u32 %s1237_s25, 7  ;;  %s840_s24 = sshll.u32 %s312_s17, 4  ;;  %s841_s24 = int_to_ptr.vmem [resolvable:$true] %s840_s24 }
 0x428   : > { %s1429_s19 = scalar_lea.hbm %s1484_s6, %s983_s11  ;;  %s1491_s18 = sand.u32 1, %s1225_s22  }
 0x429   : > { %s827_s20 = scalar_lea.sflag [#allocation4], %s1491_s18  ;;  %s1155_s8 = scalar_lea.vmem %s841_s24, 128 }
 0x42a   : > { %p1156_p2 = scmp.ne.s32.totalorder %s841_s24, %s1155_s8  ;;  %s1255_s7 = smov [#allocation3]  }
 0x42b   : > { %s1159_s14 = sshll.u32 %s1255_s7, 4  ;;  %s1160_s14 = int_to_ptr.vmem [resolvable:$false] %s1159_s14 }
 0x42c   : > { %p1157_p4 = pnand %p1156_p2, %p1340_p3  ;;  %s1161_s29 = scalar_lea.vmem %s1160_s14, 256 }
 0x42d   : > { %p1162_p6 = scmp.lt.s32.totalorder %s841_s24, %s1160_s14  ;;  %p1163_p7 = scmp.lt.s32.totalorder %s1161_s29, %s1155_s8 }
 0x42e   : > { %p1158_p5 = pneg %p1157_p4 }
 0x42f   : > { %p1164_p8 = por %p1163_p7, %p1162_p6 }
 0x431   : > { %p1165_p10 = pnand %p1164_p8, %p1158_p5 }
 0x433   : > { %1168 = shalt.err (!%p1165_p10)
}
 0x434   : > { %s1169_s25 = scalar_lea.hbm %s1429_s19, 128  ;;  %s1173_s30 = scalar_lea.hbm %s1484_s6, 256 }
 0x435   : > { %p1170_p11 = scmp.ne.s32.totalorder %s1429_s19, %s1169_s25  ;;  %p1174_p0 = scmp.lt.u32.totalorder %s1429_s19, %s1484_s6 }
 0x436   : > { %p1175_p1 = scmp.lt.u32.totalorder %s1173_s30, %s1169_s25  ;;  %p1177_p4 = scmp.lt.u32.totalorder %s1169_s25, %s1429_s19 }
 0x437   : > { %p1171_p12 = pnand %p1170_p11, %p1340_p3 }
 0x438   : > { %p1176_p2 = por %p1175_p1, %p1174_p0 }
 0x439   : > { %p1172_p13 = pneg %p1171_p12 }
 0x43a   : > { %p1178_p5 = por %p1177_p4, %p1176_p2 }
 0x43c   : > { %p1179_p6 = pnand %p1178_p5, %p1172_p13 }
 0x43e   : > { %1182 = shalt.err (!%p1179_p6)
}
 0x43f   : > { %1076 = dma.vmem_to_hbm [thread:$0]  (%p1340_p3), %s841_s24, 128, %s1429_s19, %s827_s20  }
 0x440 PF: > { %p1082_p7 = scmp.ge.s32.totalorder %s1249_s28, 2  ;;  %s852_s16 = sand.u32 1, %s1221_s21  }
 0x441   : > { %s853_s18 = scalar_lea.sflag [#allocation4], %s852_s16 }
 0x442   : > { %p1079_p8 = pnand %p1082_p7, %p1350_p9 }
 0x444   : > { %1216 = dma.done.wait (!%p1079_p8), %s853_s18, 128  }
 0x445   : > { %1218 = vsyncadd (!%p1079_p8), %s853_s18, 4294967168  ;;  %s19_s28 = sadd.s32 1, %s1249_s28   ;;  %s1492_s9 = sld [smem:[#allocation6_spill]] }
 0x446   : > { %p16_p10 = scmp.ge.s32.totalorder %s19_s28, 10   ;;  %s1493_s19 = sld [smem:[#allocation7_spill]] }
 0x447   : > { %s1494_s21 = smov %s1225_s22  ;;  %s1495_s22 = smov %s1229_s23 }
 0x448   : > { %s1496_s23 = smov %s1358_s13  ;;  %s1497_s24 = smov %s1241_s26 }
 0x449   : > { %s1498_s25 = smov %s1245_s27  ;;  %18 = sbr.rel (!%p16_p10) target bundleno = 5 (0x5), region = 99 }
 0x44b   : > { %s1499_s26 = smov %s1492_s9 }
 0x44c   : > { %s1500_s27 = smov %s1493_s19 }
 0x450   :  { %858 = vsyncpa [#allocation4], 1 }
 0x451   :  { %860 = vsyncpa [#allocation4 + $0x1], 1 }

</bundles_post_ra>
